<compile_context>
chip_gen: v6e
topology: v6e:2x2x1
jax: 0.10.0
libtpu: 0.0.40
codegen_flags: <defaults>
</compile_context>

<pallas_src>
import jax
import jax.numpy as jnp
from jax.experimental import pallas as pl
from jax.experimental.pallas import tpu as pltpu

LANE = 128        # internal (non-final) feature widths padded to lane multiples
ROW_ALIGN = 16    # sublane alignment safe for both f32 and bf16 row tiles


def _round_up(x, m):
    return (x + m - 1) // m * m


# ----------------------------------------------------------------------------
# Parameter preparation (hoist out of the per-call path; cache the result).
# ----------------------------------------------------------------------------
def prepare_params(weights, biases, compute_dtype=jnp.bfloat16):
    """Pad + cast parameters once.

    weights: list of [in, out] matrices (transposed vs. PyTorch's [out, in])
    biases:  list of [out] vectors
    Internal layers are padded to a 128-lane multiple (MXU-friendly); the FINAL
    layer keeps its true output width so the kernel's output stays compact.
    Padded rows/cols/bias entries are zero, which keeps padded channels exactly
    zero through ReLU — do not break this invariant when refactoring.
    """
    num_linear = len(weights)
    in_dim = weights[0].shape[0]
    hidden_dim = weights[-1].shape[1]
    hidden_pad = _round_up(hidden_dim, LANE)

    w_p, b_p = [], []
    for li, (w, b) in enumerate(zip(weights, biases)):
        rows = in_dim if li == 0 else hidden_pad
        cols = hidden_dim if li == num_linear - 1 else hidden_pad
        w_p.append(
            jnp.pad(w, ((0, rows - w.shape[0]), (0, cols - w.shape[1])))
            .astype(compute_dtype))
        b_p.append(
            jnp.pad(b, (0, cols - b.shape[0])).reshape(1, cols)
            .astype(jnp.float32))
    return w_p, b_p


# ----------------------------------------------------------------------------
# Kernel body.
# ----------------------------------------------------------------------------
def _make_mlp_kernel(num_linear, in_dim, compute_dtype, first_layer_on_vpu):
    """refs = (x, w1, b1, w2, b2, ..., wL, bL, out)."""

    def kernel(*refs):
        x_ref = refs[0]
        out_ref = refs[-1]
        params = refs[1:-1]

        w0_ref, b0_ref = params[0], params[1]
        if first_layer_on_vpu:
            # K == in_dim is tiny: do the first layer as `in_dim` broadcast
            # multiply-adds on the VPU (f32) instead of a K-deep matmul.
            x = x_ref[...].astype(jnp.float32)
            w0 = w0_ref[...].astype(jnp.float32)
            h = jnp.zeros((x.shape[0], w0.shape[1]), jnp.float32)
            for k in range(in_dim):
                h = h + x[:, k:k + 1] * w0[k:k + 1, :]
            h = h + b0_ref[...]
        else:
            h = jnp.dot(x_ref[...], w0_ref[...],
                        preferred_element_type=jnp.float32) + b0_ref[...]
        if num_linear > 1:                       # ReLU after every Linear but the last
            h = jnp.maximum(h, 0.0)

        for li in range(1, num_linear):
            w_ref = params[2 * li]
            b_ref = params[2 * li + 1]
            h = jnp.dot(h.astype(compute_dtype), w_ref[...],
                        preferred_element_type=jnp.float32) + b_ref[...]
            if li < num_linear - 1:
                h = jnp.maximum(h, 0.0)

        out_ref[...] = h.astype(out_ref.dtype)

    return kernel


# ----------------------------------------------------------------------------
# Tiling / VMEM helpers.
# ----------------------------------------------------------------------------
def _choose_row_tile(n_rows, tile_rows, min_grid_steps):
    """Row tile: >= min_grid_steps grid steps when rows are non-trivial, tile
    derived from cdiv(n_rows, steps) to avoid a near-empty padded last tile."""
    n_aligned = _round_up(max(n_rows, 1), ROW_ALIGN)
    max_tile = _round_up(tile_rows, ROW_ALIGN)
    if n_aligned <= 2 * ROW_ALIGN:               # tiny batch: single step
        return n_aligned
    steps = max(min_grid_steps, pl.cdiv(n_aligned, max_tile))
    tile = _round_up(pl.cdiv(n_rows, steps), ROW_ALIGN)
    return min(tile, max_tile)


def _vmem_limit_bytes(est_bytes):
    """Generation-aware VMEM limit: ~90% of physical capacity as the ceiling."""
    try:
        info = pltpu.get_tpu_info()
        cap = int(getattr(info, "vmem_capacity_bytes", 64 * 1024 * 1024))
    except Exception:
        cap = 64 * 1024 * 1024                    # conservative fallback (v7x)
    ceiling = int(0.9 * cap)
    want = max(32 * 1024 * 1024, int(1.25 * est_bytes))   # modest headroom only
    return int(min(ceiling, want))


# ----------------------------------------------------------------------------
# Wrapper.
# ----------------------------------------------------------------------------
def action_encoder_continuous(actions, weights=None, biases=None, *,
                              prepared=None, tile_rows=512,
                              compute_dtype=jnp.bfloat16, out_dtype=None,
                              single_buffer_params=True, min_grid_steps=4):
    """Pallas forward pass of ActionEncoderContinuous.

    actions:  [..., input_dim] (any leading dims, feature dim last)
    weights/biases: raw per-layer params (weights stored [in, out]); OR pass
    `prepared=prepare_params(weights, biases)` to hoist the pad/cast out of the
    per-call path (recommended under jit).
    """
    if prepared is None:
        prepared = prepare_params(weights, biases, compute_dtype)
    w_p, b_p = prepared
    compute_dtype = w_p[0].dtype

    num_linear = len(w_p)
    in_dim = w_p[0].shape[0]
    hidden_pad = w_p[0].shape[1]          # padded internal width
    out_cols = w_p[-1].shape[1]           # true hidden_dim (compact final layer)
    out_dtype = actions.dtype if out_dtype is None else out_dtype

    lead_shape = actions.shape[:-1]
    x = actions.reshape(-1, in_dim)
    n_rows = x.shape[0]

    # ---- row tiling ----------------------------------------------------------
    tile = _choose_row_tile(n_rows, tile_rows, min_grid_steps)
    grid_steps = pl.cdiv(n_rows, tile)
    n_pad = grid_steps * tile
    if n_pad != n_rows:
        x = jnp.pad(x, ((0, n_pad - n_rows), (0, 0)))
    x_c = x.astype(compute_dtype)

    first_layer_on_vpu = in_dim <= 16

    # ---- specs ---------------------------------------------------------------
    # Resident params: constant index_map -> single-buffer them (halves their VMEM).
    param_mode = pl.Buffered(1) if single_buffer_params else None
    in_specs = [pl.BlockSpec((tile, in_dim), lambda i: (i, 0))]
    for w, b in zip(w_p, b_p):
        in_specs.append(pl.BlockSpec(w.shape, lambda i: (0, 0),
                                     pipeline_mode=param_mode))
        in_specs.append(pl.BlockSpec(b.shape, lambda i: (0, 0),
                                     pipeline_mode=param_mode))
    out_spec = pl.BlockSpec((tile, out_cols), lambda i: (i, 0))

    # ---- VMEM budget + cost estimate -----------------------------------------
    bpe_c = jnp.dtype(compute_dtype).itemsize
    bpe_o = jnp.dtype(out_dtype).itemsize
    param_bytes = sum(int(a.size) * a.dtype.itemsize for a in (w_p + b_p))
    param_bufs = 1 if single_buffer_params else 2
    est = (2 * tile * in_dim * bpe_c          # x (double-buffered)
           + 2 * tile * out_cols * bpe_o      # out (double-buffered)
           + param_bufs * param_bytes         # resident params
           + 2 * tile * hidden_pad * 4)       # f32 intermediates
    vmem_limit = _vmem_limit_bytes(est)

    flops = 2 * n_pad * sum(int(w.shape[0]) * int(w.shape[1]) for w in w_p)
    bytes_accessed = (n_pad * in_dim * bpe_c + param_bytes
                      + n_pad * out_cols * bpe_o)
    cost = pl.CostEstimate(flops=int(flops), transcendentals=0,
                           bytes_accessed=int(bytes_accessed))

    kernel = _make_mlp_kernel(num_linear, in_dim, compute_dtype,
                              first_layer_on_vpu)

    y = pl.pallas_call(
        kernel,
        out_shape=jax.ShapeDtypeStruct((n_pad, out_cols), out_dtype),
        grid_spec=pltpu.PrefetchScalarGridSpec(
            num_scalar_prefetch=0,
            grid=(grid_steps,),
            in_specs=in_specs,
            out_specs=out_spec,
        ),
        compiler_params=pltpu.CompilerParams(
            dimension_semantics=("parallel",),
            vmem_limit_bytes=vmem_limit,
        ),
        cost_estimate=cost,
    )(x_c, *[a for pair in zip(w_p, b_p) for a in pair])

    if n_pad != n_rows:
        y = y[:n_rows]
    return y.reshape(*lead_shape, out_cols)


# ----------------------------------------------------------------------------
# PyTorch-shaped init + pure-JAX reference.
# ----------------------------------------------------------------------------
def init_params(key, input_dim, hidden_dim, num_layers, dtype=jnp.float32):
    """Linear(in,h), (num_layers-1)*Linear(h,h), Linear(h,h).
    Weights stored as [in, out] (transposed vs. torch's [out, in])."""
    dims = [input_dim] + [hidden_dim] * (num_layers + 1)
    weights, biases = [], []
    for li in range(len(dims) - 1):
        fan_in, fan_out = dims[li], dims[li + 1]
        key, kw, kb = jax.random.split(key, 3)
        bound = 1.0 / (fan_in ** 0.5)            # torch.nn.Linear default bound
        weights.append(jax.random.uniform(kw, (fan_in, fan_out), dtype, -bound, bound))
        biases.append(jax.random.uniform(kb, (fan_out,), dtype, -bound, bound))
    return weights, biases


def reference_mlp(x, weights, biases):
    h = x.astype(jnp.float32)
    for li, (w, b) in enumerate(zip(weights, biases)):
        h = h @ w + b
        if li < len(weights) - 1:
            h = jnp.maximum(h, 0.0)
    return h.astype(x.dtype)


if __name__ == "__main__":
    # Small shapes consistent with the module: actions [batch, seq, input_dim].
    batch, seq = 2, 8
    input_dim, hidden_dim, num_layers = 4, 32, 2

    key = jax.random.PRNGKey(0)
    key, k_act = jax.random.split(key)
    actions = jax.random.normal(k_act, (batch, seq, input_dim), dtype=jnp.float32)

    weights, biases = init_params(key, input_dim, hidden_dim, num_layers)

    # Hoisted (cacheable) parameter preparation.
    prepared = prepare_params(weights, biases)

    try:
        out = action_encoder_continuous(actions, prepared=prepared)
        out = jax.block_until_ready(out)
    except Exception:
        # Fallback if this JAX build rejects single-buffered (Buffered(1)) params.
        out = action_encoder_continuous(actions, prepared=prepared,
                                        single_buffer_params=False)
        out = jax.block_until_ready(out)

    ref = reference_mlp(actions.reshape(-1, input_dim), weights, biases).reshape(
        batch, seq, hidden_dim
    )
    assert out.shape == (batch, seq, hidden_dim), out.shape
    # bf16 weights/activations with f32 accumulation -> loosened tolerance vs f32 ref.
    assert jnp.allclose(out, ref, atol=2e-2, rtol=2e-2), "mismatch vs reference"

    print("KERNEL_OK")
</pallas_src>

<mosaic_0001>
module attributes {stable_mosaic.version = 11 : i64} {
  func.func @kernel(%arg0: i32, %arg1: memref<16x4xbf16, #tpu.memory_space<vmem>>, %arg2: memref<4x128xbf16, #tpu.memory_space<vmem>>, %arg3: memref<1x128xf32, #tpu.memory_space<vmem>>, %arg4: memref<128x128xbf16, #tpu.memory_space<vmem>>, %arg5: memref<1x128xf32, #tpu.memory_space<vmem>>, %arg6: memref<128x32xbf16, #tpu.memory_space<vmem>>, %arg7: memref<1x32xf32, #tpu.memory_space<vmem>>, %arg8: memref<16x32xf32, #tpu.memory_space<vmem>>) attributes {dimension_semantics = [#tpu.dimension_semantics<parallel>], iteration_bounds = array<i64: 1>, scalar_prefetch = 0 : i64, scratch_operands = 0 : i64, tpu.core_type = #tpu.core_type<tc>, window_params = [{transform_indices = @transform_0, window_bounds = array<i64: 16, 4>}, {pipeline_mode = #tpu.pipeline_mode<synchronous>, transform_indices = @transform_1, window_bounds = array<i64: 4, 128>}, {pipeline_mode = #tpu.pipeline_mode<synchronous>, transform_indices = @transform_2, window_bounds = array<i64: 1, 128>}, {pipeline_mode = #tpu.pipeline_mode<synchronous>, transform_indices = @transform_3, window_bounds = array<i64: 128, 128>}, {pipeline_mode = #tpu.pipeline_mode<synchronous>, transform_indices = @transform_4, window_bounds = array<i64: 1, 128>}, {pipeline_mode = #tpu.pipeline_mode<synchronous>, transform_indices = @transform_5, window_bounds = array<i64: 128, 32>}, {pipeline_mode = #tpu.pipeline_mode<synchronous>, transform_indices = @transform_6, window_bounds = array<i64: 1, 32>}, {transform_indices = @transform_7, window_bounds = array<i64: 16, 32>}]} {
    %c0 = arith.constant 0 : index
    %c0_0 = arith.constant 0 : index
    %0 = vector.load %arg1[%c0, %c0_0] : memref<16x4xbf16, #tpu.memory_space<vmem>>, vector<16x4xbf16>
    %1 = arith.extf %0 : vector<16x4xbf16> to vector<16x4xf32>
    %c0_1 = arith.constant 0 : index
    %c0_2 = arith.constant 0 : index
    %2 = vector.load %arg2[%c0_1, %c0_2] : memref<4x128xbf16, #tpu.memory_space<vmem>>, vector<4x128xbf16>
    %3 = arith.extf %2 : vector<4x128xbf16> to vector<4x128xf32>
    %cst = arith.constant 0.000000e+00 : f32
    %4 = vector.broadcast %cst : f32 to vector<16x128xf32>
    %5 = vector.extract_strided_slice %1 {offsets = [0, 0], sizes = [16, 1], strides = [1, 1]} : vector<16x4xf32> to vector<16x1xf32>
    %6 = vector.extract_strided_slice %3 {offsets = [0, 0], sizes = [1, 128], strides = [1, 1]} : vector<4x128xf32> to vector<1x128xf32>
    %7 = vector.broadcast %5 : vector<16x1xf32> to vector<16x128xf32>
    %8 = vector.broadcast %6 : vector<1x128xf32> to vector<16x128xf32>
    %9 = arith.mulf %7, %8 : vector<16x128xf32>
    %10 = arith.addf %4, %9 : vector<16x128xf32>
    %11 = vector.extract_strided_slice %1 {offsets = [0, 1], sizes = [16, 1], strides = [1, 1]} : vector<16x4xf32> to vector<16x1xf32>
    %12 = vector.extract_strided_slice %3 {offsets = [1, 0], sizes = [1, 128], strides = [1, 1]} : vector<4x128xf32> to vector<1x128xf32>
    %13 = vector.broadcast %11 : vector<16x1xf32> to vector<16x128xf32>
    %14 = vector.broadcast %12 : vector<1x128xf32> to vector<16x128xf32>
    %15 = arith.mulf %13, %14 : vector<16x128xf32>
    %16 = arith.addf %10, %15 : vector<16x128xf32>
    %17 = vector.extract_strided_slice %1 {offsets = [0, 2], sizes = [16, 1], strides = [1, 1]} : vector<16x4xf32> to vector<16x1xf32>
    %18 = vector.extract_strided_slice %3 {offsets = [2, 0], sizes = [1, 128], strides = [1, 1]} : vector<4x128xf32> to vector<1x128xf32>
    %19 = vector.broadcast %17 : vector<16x1xf32> to vector<16x128xf32>
    %20 = vector.broadcast %18 : vector<1x128xf32> to vector<16x128xf32>
    %21 = arith.mulf %19, %20 : vector<16x128xf32>
    %22 = arith.addf %16, %21 : vector<16x128xf32>
    %23 = vector.extract_strided_slice %1 {offsets = [0, 3], sizes = [16, 1], strides = [1, 1]} : vector<16x4xf32> to vector<16x1xf32>
    %24 = vector.extract_strided_slice %3 {offsets = [3, 0], sizes = [1, 128], strides = [1, 1]} : vector<4x128xf32> to vector<1x128xf32>
    %25 = vector.broadcast %23 : vector<16x1xf32> to vector<16x128xf32>
    %26 = vector.broadcast %24 : vector<1x128xf32> to vector<16x128xf32>
    %27 = arith.mulf %25, %26 : vector<16x128xf32>
    %28 = arith.addf %22, %27 : vector<16x128xf32>
    %c0_3 = arith.constant 0 : index
    %c0_4 = arith.constant 0 : index
    %29 = vector.load %arg3[%c0_3, %c0_4] : memref<1x128xf32, #tpu.memory_space<vmem>>, vector<1x128xf32>
    %30 = vector.broadcast %29 : vector<1x128xf32> to vector<16x128xf32>
    %31 = arith.addf %28, %30 : vector<16x128xf32>
    %cst_5 = arith.constant 0.000000e+00 : f32
    %32 = vector.broadcast %cst_5 : f32 to vector<16x128xf32>
    %33 = arith.maximumf %31, %32 : vector<16x128xf32>
    %34 = arith.truncf %33 : vector<16x128xf32> to vector<16x128xbf16>
    %c0_6 = arith.constant 0 : index
    %c0_7 = arith.constant 0 : index
    %35 = vector.load %arg4[%c0_6, %c0_7] : memref<128x128xbf16, #tpu.memory_space<vmem>>, vector<128x128xbf16>
    %cst_8 = arith.constant dense<0.000000e+00> : vector<16x128xf32>
    %36 = tpu.matmul %34, %35, %cst_8 {dimension_numbers = #tpu.dot_dimension_numbers<[1], [0], [0], [1], [0, 0, 1, 1], [], []>} : vector<16x128xbf16>, vector<128x128xbf16>, vector<16x128xf32> -> vector<16x128xf32>
    %c0_9 = arith.constant 0 : index
    %c0_10 = arith.constant 0 : index
    %37 = vector.load %arg5[%c0_9, %c0_10] : memref<1x128xf32, #tpu.memory_space<vmem>>, vector<1x128xf32>
    %38 = vector.broadcast %37 : vector<1x128xf32> to vector<16x128xf32>
    %39 = arith.addf %36, %38 : vector<16x128xf32>
    %cst_11 = arith.constant 0.000000e+00 : f32
    %40 = vector.broadcast %cst_11 : f32 to vector<16x128xf32>
    %41 = arith.maximumf %39, %40 : vector<16x128xf32>
    %42 = arith.truncf %41 : vector<16x128xf32> to vector<16x128xbf16>
    %c0_12 = arith.constant 0 : index
    %c0_13 = arith.constant 0 : index
    %43 = vector.load %arg6[%c0_12, %c0_13] : memref<128x32xbf16, #tpu.memory_space<vmem>>, vector<128x32xbf16>
    %cst_14 = arith.constant dense<0.000000e+00> : vector<16x32xf32>
    %44 = tpu.matmul %42, %43, %cst_14 {dimension_numbers = #tpu.dot_dimension_numbers<[1], [0], [0], [1], [0, 0, 1, 1], [], []>} : vector<16x128xbf16>, vector<128x32xbf16>, vector<16x32xf32> -> vector<16x32xf32>
    %c0_15 = arith.constant 0 : index
    %c0_16 = arith.constant 0 : index
    %45 = vector.load %arg7[%c0_15, %c0_16] : memref<1x32xf32, #tpu.memory_space<vmem>>, vector<1x32xf32>
    %46 = vector.broadcast %45 : vector<1x32xf32> to vector<16x32xf32>
    %47 = arith.addf %44, %46 : vector<16x32xf32>
    %c0_17 = arith.constant 0 : index
    %c0_18 = arith.constant 0 : index
    %48 = vector.load %arg8[%c0_17, %c0_18] : memref<16x32xf32, #tpu.memory_space<vmem>>, vector<16x32xf32>
    tpu.vector_store %arg8[%c0_17, %c0_18], %47 {strides = array<i32>} : memref<16x32xf32, #tpu.memory_space<vmem>>, vector<16x32xf32>,
    return
  }
  func.func @transform_0(%arg0: i32) -> (i32, i32) {
    %c0_i32 = arith.constant 0 : i32
    %c0_i32_0 = arith.constant 0 : i32
    return %arg0, %c0_i32 : i32, i32
  }
  func.func @transform_1(%arg0: i32) -> (i32, i32) {
    %c0_i32 = arith.constant 0 : i32
    %c0_i32_0 = arith.constant 0 : i32
    %c0_i32_1 = arith.constant 0 : i32
    return %c0_i32, %c0_i32_0 : i32, i32
  }
  func.func @transform_2(%arg0: i32) -> (i32, i32) {
    %c0_i32 = arith.constant 0 : i32
    %c0_i32_0 = arith.constant 0 : i32
    %c0_i32_1 = arith.constant 0 : i32
    return %c0_i32, %c0_i32_0 : i32, i32
  }
  func.func @transform_3(%arg0: i32) -> (i32, i32) {
    %c0_i32 = arith.constant 0 : i32
    %c0_i32_0 = arith.constant 0 : i32
    %c0_i32_1 = arith.constant 0 : i32
    return %c0_i32, %c0_i32_0 : i32, i32
  }
  func.func @transform_4(%arg0: i32) -> (i32, i32) {
    %c0_i32 = arith.constant 0 : i32
    %c0_i32_0 = arith.constant 0 : i32
    %c0_i32_1 = arith.constant 0 : i32
    return %c0_i32, %c0_i32_0 : i32, i32
  }
  func.func @transform_5(%arg0: i32) -> (i32, i32) {
    %c0_i32 = arith.constant 0 : i32
    %c0_i32_0 = arith.constant 0 : i32
    %c0_i32_1 = arith.constant 0 : i32
    return %c0_i32, %c0_i32_0 : i32, i32
  }
  func.func @transform_6(%arg0: i32) -> (i32, i32) {
    %c0_i32 = arith.constant 0 : i32
    %c0_i32_0 = arith.constant 0 : i32
    %c0_i32_1 = arith.constant 0 : i32
    return %c0_i32, %c0_i32_0 : i32, i32
  }
  func.func @transform_7(%arg0: i32) -> (i32, i32) {
    %c0_i32 = arith.constant 0 : i32
    %c0_i32_0 = arith.constant 0 : i32
    return %arg0, %c0_i32 : i32, i32
  }
}

module attributes {stable_mosaic.version = 11 : i64} {
  func.func @kernel(%arg0: i32, %arg1: memref<16x4xbf16, #tpu.memory_space<vmem>>, %arg2: memref<4x128xbf16, #tpu.memory_space<vmem>>, %arg3: memref<1x128xf32, #tpu.memory_space<vmem>>, %arg4: memref<128x128xbf16, #tpu.memory_space<vmem>>, %arg5: memref<1x128xf32, #tpu.memory_space<vmem>>, %arg6: memref<128x32xbf16, #tpu.memory_space<vmem>>, %arg7: memref<1x32xf32, #tpu.memory_space<vmem>>, %arg8: memref<16x32xf32, #tpu.memory_space<vmem>>) attributes {dimension_semantics = [#tpu.dimension_semantics<parallel>], iteration_bounds = array<i64: 1>, scalar_prefetch = 0 : i64, scratch_operands = 0 : i64, tpu.core_type = #tpu.core_type<tc>, window_params = [{transform_indices = @transform_0, window_bounds = array<i64: 16, 4>}, {pipeline_mode = #tpu.pipeline_mode<synchronous>, transform_indices = @transform_1, window_bounds = array<i64: 4, 128>}, {pipeline_mode = #tpu.pipeline_mode<synchronous>, transform_indices = @transform_2, window_bounds = array<i64: 1, 128>}, {pipeline_mode = #tpu.pipeline_mode<synchronous>, transform_indices = @transform_3, window_bounds = array<i64: 128, 128>}, {pipeline_mode = #tpu.pipeline_mode<synchronous>, transform_indices = @transform_4, window_bounds = array<i64: 1, 128>}, {pipeline_mode = #tpu.pipeline_mode<synchronous>, transform_indices = @transform_5, window_bounds = array<i64: 128, 32>}, {pipeline_mode = #tpu.pipeline_mode<synchronous>, transform_indices = @transform_6, window_bounds = array<i64: 1, 32>}, {transform_indices = @transform_7, window_bounds = array<i64: 16, 32>}]} {
    %c0 = arith.constant 0 : index
    %c0_0 = arith.constant 0 : index
    %0 = vector.load %arg1[%c0, %c0_0] : memref<16x4xbf16, #tpu.memory_space<vmem>>, vector<16x4xbf16>
    %1 = arith.extf %0 : vector<16x4xbf16> to vector<16x4xf32>
    %c0_1 = arith.constant 0 : index
    %c0_2 = arith.constant 0 : index
    %2 = vector.load %arg2[%c0_1, %c0_2] : memref<4x128xbf16, #tpu.memory_space<vmem>>, vector<4x128xbf16>
    %3 = arith.extf %2 : vector<4x128xbf16> to vector<4x128xf32>
    %cst = arith.constant 0.000000e+00 : f32
    %4 = vector.broadcast %cst : f32 to vector<16x128xf32>
    %5 = vector.extract_strided_slice %1 {offsets = [0, 0], sizes = [16, 1], strides = [1, 1]} : vector<16x4xf32> to vector<16x1xf32>
    %6 = vector.extract_strided_slice %3 {offsets = [0, 0], sizes = [1, 128], strides = [1, 1]} : vector<4x128xf32> to vector<1x128xf32>
    %7 = vector.broadcast %5 : vector<16x1xf32> to vector<16x128xf32>
    %8 = vector.broadcast %6 : vector<1x128xf32> to vector<16x128xf32>
    %9 = arith.mulf %7, %8 : vector<16x128xf32>
    %10 = arith.addf %4, %9 : vector<16x128xf32>
    %11 = vector.extract_strided_slice %1 {offsets = [0, 1], sizes = [16, 1], strides = [1, 1]} : vector<16x4xf32> to vector<16x1xf32>
    %12 = vector.extract_strided_slice %3 {offsets = [1, 0], sizes = [1, 128], strides = [1, 1]} : vector<4x128xf32> to vector<1x128xf32>
    %13 = vector.broadcast %11 : vector<16x1xf32> to vector<16x128xf32>
    %14 = vector.broadcast %12 : vector<1x128xf32> to vector<16x128xf32>
    %15 = arith.mulf %13, %14 : vector<16x128xf32>
    %16 = arith.addf %10, %15 : vector<16x128xf32>
    %17 = vector.extract_strided_slice %1 {offsets = [0, 2], sizes = [16, 1], strides = [1, 1]} : vector<16x4xf32> to vector<16x1xf32>
    %18 = vector.extract_strided_slice %3 {offsets = [2, 0], sizes = [1, 128], strides = [1, 1]} : vector<4x128xf32> to vector<1x128xf32>
    %19 = vector.broadcast %17 : vector<16x1xf32> to vector<16x128xf32>
    %20 = vector.broadcast %18 : vector<1x128xf32> to vector<16x128xf32>
    %21 = arith.mulf %19, %20 : vector<16x128xf32>
    %22 = arith.addf %16, %21 : vector<16x128xf32>
    %23 = vector.extract_strided_slice %1 {offsets = [0, 3], sizes = [16, 1], strides = [1, 1]} : vector<16x4xf32> to vector<16x1xf32>
    %24 = vector.extract_strided_slice %3 {offsets = [3, 0], sizes = [1, 128], strides = [1, 1]} : vector<4x128xf32> to vector<1x128xf32>
    %25 = vector.broadcast %23 : vector<16x1xf32> to vector<16x128xf32>
    %26 = vector.broadcast %24 : vector<1x128xf32> to vector<16x128xf32>
    %27 = arith.mulf %25, %26 : vector<16x128xf32>
    %28 = arith.addf %22, %27 : vector<16x128xf32>
    %c0_3 = arith.constant 0 : index
    %c0_4 = arith.constant 0 : index
    %29 = vector.load %arg3[%c0_3, %c0_4] : memref<1x128xf32, #tpu.memory_space<vmem>>, vector<1x128xf32>
    %30 = vector.broadcast %29 : vector<1x128xf32> to vector<16x128xf32>
    %31 = arith.addf %28, %30 : vector<16x128xf32>
    %cst_5 = arith.constant 0.000000e+00 : f32
    %32 = vector.broadcast %cst_5 : f32 to vector<16x128xf32>
    %33 = arith.maximumf %31, %32 : vector<16x128xf32>
    %34 = arith.truncf %33 : vector<16x128xf32> to vector<16x128xbf16>
    %c0_6 = arith.constant 0 : index
    %c0_7 = arith.constant 0 : index
    %35 = vector.load %arg4[%c0_6, %c0_7] : memref<128x128xbf16, #tpu.memory_space<vmem>>, vector<128x128xbf16>
    %cst_8 = arith.constant dense<0.000000e+00> : vector<16x128xf32>
    %36 = tpu.matmul %34, %35, %cst_8 {dimension_numbers = #tpu.dot_dimension_numbers<[1], [0], [0], [1], [0, 0, 1, 1], [], []>} : vector<16x128xbf16>, vector<128x128xbf16>, vector<16x128xf32> -> vector<16x128xf32>
    %c0_9 = arith.constant 0 : index
    %c0_10 = arith.constant 0 : index
    %37 = vector.load %arg5[%c0_9, %c0_10] : memref<1x128xf32, #tpu.memory_space<vmem>>, vector<1x128xf32>
    %38 = vector.broadcast %37 : vector<1x128xf32> to vector<16x128xf32>
    %39 = arith.addf %36, %38 : vector<16x128xf32>
    %cst_11 = arith.constant 0.000000e+00 : f32
    %40 = vector.broadcast %cst_11 : f32 to vector<16x128xf32>
    %41 = arith.maximumf %39, %40 : vector<16x128xf32>
    %42 = arith.truncf %41 : vector<16x128xf32> to vector<16x128xbf16>
    %c0_12 = arith.constant 0 : index
    %c0_13 = arith.constant 0 : index
    %43 = vector.load %arg6[%c0_12, %c0_13] : memref<128x32xbf16, #tpu.memory_space<vmem>>, vector<128x32xbf16>
    %cst_14 = arith.constant dense<0.000000e+00> : vector<16x32xf32>
    %44 = tpu.matmul %42, %43, %cst_14 {dimension_numbers = #tpu.dot_dimension_numbers<[1], [0], [0], [1], [0, 0, 1, 1], [], []>} : vector<16x128xbf16>, vector<128x32xbf16>, vector<16x32xf32> -> vector<16x32xf32>
    %c0_15 = arith.constant 0 : index
    %c0_16 = arith.constant 0 : index
    %45 = vector.load %arg7[%c0_15, %c0_16] : memref<1x32xf32, #tpu.memory_space<vmem>>, vector<1x32xf32>
    %46 = vector.broadcast %45 : vector<1x32xf32> to vector<16x32xf32>
    %47 = arith.addf %44, %46 : vector<16x32xf32>
    %c0_17 = arith.constant 0 : index
    %c0_18 = arith.constant 0 : index
    %48 = vector.load %arg8[%c0_17, %c0_18] : memref<16x32xf32, #tpu.memory_space<vmem>>, vector<16x32xf32>
    tpu.vector_store %arg8[%c0_17, %c0_18], %47 {strides = array<i32>} : memref<16x32xf32, #tpu.memory_space<vmem>>, vector<16x32xf32>,
    return
  }
  func.func @transform_0(%arg0: i32) -> (i32, i32) {
    %c0_i32 = arith.constant 0 : i32
    %c0_i32_0 = arith.constant 0 : i32
    return %arg0, %c0_i32 : i32, i32
  }
  func.func @transform_1(%arg0: i32) -> (i32, i32) {
    %c0_i32 = arith.constant 0 : i32
    %c0_i32_0 = arith.constant 0 : i32
    %c0_i32_1 = arith.constant 0 : i32
    return %c0_i32, %c0_i32_0 : i32, i32
  }
  func.func @transform_2(%arg0: i32) -> (i32, i32) {
    %c0_i32 = arith.constant 0 : i32
    %c0_i32_0 = arith.constant 0 : i32
    %c0_i32_1 = arith.constant 0 : i32
    return %c0_i32, %c0_i32_0 : i32, i32
  }
  func.func @transform_3(%arg0: i32) -> (i32, i32) {
    %c0_i32 = arith.constant 0 : i32
    %c0_i32_0 = arith.constant 0 : i32
    %c0_i32_1 = arith.constant 0 : i32
    return %c0_i32, %c0_i32_0 : i32, i32
  }
  func.func @transform_4(%arg0: i32) -> (i32, i32) {
    %c0_i32 = arith.constant 0 : i32
    %c0_i32_0 = arith.constant 0 : i32
    %c0_i32_1 = arith.constant 0 : i32
    return %c0_i32, %c0_i32_0 : i32, i32
  }
  func.func @transform_5(%arg0: i32) -> (i32, i32) {
    %c0_i32 = arith.constant 0 : i32
    %c0_i32_0 = arith.constant 0 : i32
    %c0_i32_1 = arith.constant 0 : i32
    return %c0_i32, %c0_i32_0 : i32, i32
  }
  func.func @transform_6(%arg0: i32) -> (i32, i32) {
    %c0_i32 = arith.constant 0 : i32
    %c0_i32_0 = arith.constant 0 : i32
    %c0_i32_1 = arith.constant 0 : i32
    return %c0_i32, %c0_i32_0 : i32, i32
  }
  func.func @transform_7(%arg0: i32) -> (i32, i32) {
    %c0_i32 = arith.constant 0 : i32
    %c0_i32_0 = arith.constant 0 : i32
    return %arg0, %c0_i32 : i32, i32
  }
}

</mosaic_0001>

<bundles_post_ra>
// kernel: tpu_custom_call.1
= control target key start
LH: loop header
LB: loop body
LE: loop exit
PB: predicated region body
PF: predicated region fallthrough
CT: control target
= control target key end

     0   :  { %v511_v2 = vmov 0   ;;  %v512_v5 = vmov 2   ;;  %v513_v6 = vmov 0.0   ;;  %v514_v10 = vmov 1   ;;  %s644_s0 = inlined_call_operand.vmem [shape: bf16[16,4], index: 0, kind: input, shape index: {}]   ;;  %s645_s1 = inlined_call_operand.vmem [shape: bf16[4,128], index: 1, kind: input, shape index: {}]   ;;  %s646_s2 = inlined_call_operand.vmem [shape: f32[1,128], index: 2, kind: input, shape index: {}]   ;;  %s647_s3 = inlined_call_operand.vmem [shape: bf16[128,128], index: 3, kind: input, shape index: {}]   ;;  %s648_s4 = inlined_call_operand.vmem [shape: f32[1,128], index: 4, kind: input, shape index: {}]   ;;  %s649_s5 = inlined_call_operand.vmem [shape: bf16[128,32], index: 5, kind: input, shape index: {}]   ;;  %s650_s6 = inlined_call_operand.vmem [shape: f32[1,32], index: 6, kind: input, shape index: {}]   ;;  %s651_s7 = inlined_call_operand.hbm [shape: f32[16,32], index: 7, kind: output, shape index: {}]  }
   0x1   :  { %v378_v0 = vld [vmem:[%s644_s0] sm:$0xff]   ;;  %v473_v1 = vld [vmem:[%s647_s3 + $0x38] sm:$0xff]   ;;  %448 = vset.pattern.permute.xlu0 %v511_v2  ;;  %460 = vset.pattern.permute.xlu1 %v512_v5  ;;  %v474_v8 = vld [vmem:[%s647_s3 + $0x30] sm:$0xff]   ;;  %v515_v11 = vmov 3   ;;  %vm516_vm0 = vmmov 0  }
   0x2   :  { %v379_v3 = vunpack.c.l.bf16 %v378_v0  ;;  %v380_v4 = vunpack.c.h.bf16 %v378_v0  ;;  %399 = vmatprep.subr.bf16.mxu0 %v513_v6  ;;  %419 = vmatprep.subr.bf16.mxu1 %v513_v6  ;;  %v475_v9 = vld [vmem:[%s647_s3 + $0x28] sm:$0xff]   ;;  %v476_v12 = vld [vmem:[%s647_s3 + $0x20] sm:$0xff]   ;;  %v477_v13 = vld [vmem:[%s647_s3 + $0x18] sm:$0xff]  }
   0x3   :  { %400 = vmatpush3.bf16.msra.mxu0 %v473_v1  ;;  %415 = vmatprep.mubr.msk.bf16.mxu0 %vm516_vm0, %v513_v6 }
   0x4   :  { %v449_v7 = vpack.i.bf16 %v380_v4, %v379_v3  ;;  %401 = vmatprep.subr.bf16.mxu0 %v513_v6 }
   0x6   :  { %450 = vperm.xlu0 %448, %v449_v7   ;;  %462 = vperm.xlu1 %460, %v449_v7  }
   0x7   :  { %402 = vmatpush3.bf16.msra.mxu0 %v474_v8 }
   0x8   :  { %403 = vmatprep.subr.bf16.mxu0 %v513_v6 }
   0xa   :  { %454 = vset.pattern.permute.xlu0 %v514_v10  ;;  %466 = vset.pattern.permute.xlu1 %v515_v11 }
   0xb   :  { %456 = vperm.xlu0 %454, %v449_v7   ;;  %468 = vperm.xlu1 %466, %v449_v7  }
   0xc   :  { %404 = vmatpush3.bf16.msra.mxu0 %v475_v9 }
   0xd   :  { %405 = vmatprep.subr.bf16.mxu0 %v513_v6 }
   0xf   :  { %472 = vset.pattern.permute.xlu0 %v515_v11 }
  0x10   :  { %406 = vmatpush3.bf16.msra.mxu0 %v476_v12 }
  0x11   :  { %12 = vsyncpa [#allocation3], 0  ;;  %407 = vmatprep.subr.bf16.mxu0 %v513_v6  ;;  %435 = vmatprep.mubr.msk.bf16.mxu1 %vm516_vm0, %v513_v6  ;;  %v478_v14 = vld [vmem:[%s647_s3 + $0x10] sm:$0xff]   ;;  %v481_v15 = vld [vmem:[%s649_s5 + $0x38] sm:$0xff]   ;;  %v44_v22 = vlaneseq  ;;  %vm339_vm1 = vcmask 261120  }
  0x12   :  { %v479_v16 = vld [vmem:[%s647_s3 + $0x8] sm:$0xff]   ;;  %420 = vmatpush3.bf16.msra.mxu1 %v481_v15  ;;  %v482_v17 = vld [vmem:[%s649_s5 + $0x30] sm:$0xff]   ;;  %v480_v18 = vld [vmem:[%s647_s3] sm:$0xff]  }
  0x13   :  { %421 = vmatprep.subr.bf16.mxu1 %v513_v6  ;;  %v483_v19 = vld [vmem:[%s649_s5 + $0x28] sm:$0xff]   ;;  %v484_v20 = vld [vmem:[%s649_s5 + $0x20] sm:$0xff]   ;;  %v485_v21 = vld [vmem:[%s649_s5 + $0x18] sm:$0xff]   ;;  %v45_v23 = vshrl.u32 %v44_v22, 7 }
  0x14   :  { %408 = vmatpush3.bf16.msra.mxu0 %v477_v13  ;;  %v32_v24 = vld [vmem:[%s645_s1] sm:$0x3]  ;;  %v486_v2 = vld [vmem:[%s649_s5 + $0x10] sm:$0xff]   ;;  %v487_v3 = vld [vmem:[%s649_s5 + $0x8] sm:$0xff]  }
  0x15   :  { %409 = vmatprep.subr.bf16.mxu0 %v513_v6  ;;  %v33_v25 = vunpack.c.l.bf16 %v32_v24  ;;  %v46_v26 = vsub.s32 0, %v45_v23  ;;  %v62_v29 = vsub.s32 1, %v45_v23  ;;  %v78_v30 = vsub.s32 2, %v45_v23  ;;  %v358_v58 = vld [vmem:[%s646_s2] ss:$0 sm:$0xff] }
  0x16   :  { %422 = vmatpush3.bf16.msra.mxu1 %v482_v17  ;;  %v94_v31 = vsub.s32 3, %v45_v23  ;;  %v488_v4 = vld [vmem:[%s649_s5] sm:$0xff]   ;;  %s517_s5 = smov [#allocation2]  }
  0x17   :  { %423 = vmatprep.subr.bf16.mxu1 %v513_v6  ;;  %v47_v32 = vrot.slane %v33_v25, %v46_v26  ;;  %v63_v35 = vrot.slane %v33_v25, %v62_v29  ;;  %v79_v36 = vrot.slane %v33_v25, %v78_v30  ;;  %v359_v5 = vld [vmem:[%s648_s4] ss:$0 sm:$0xff]  ;;  %s347_s15 = sshll.u32 %s517_s5, 4  ;;  %s348_s15 = int_to_ptr.vmem [resolvable:$true] %s347_s15 }
  0x18   :  { %410 = vmatpush3.bf16.msra.mxu0 %v478_v14  ;;  %v95_v40 = vrot.slane %v33_v25, %v94_v31  ;;  %s489_s4 = scalar_lea.vmem %s348_s15, 256  ;;  %p494_p1 = scmp.lt.s32.totalorder %s348_s15, %s348_s15 }
  0x19   :  { %411 = vmatprep.subr.bf16.mxu0 %v513_v6  ;;  %p490_p0 = scmp.ne.s32.totalorder %s348_s15, %s489_s4  ;;  %p495_p2 = scmp.lt.s32.totalorder %s489_s4, %s489_s4 }
  0x1a   :  { %424 = vmatpush3.bf16.msra.mxu1 %v483_v19 }
  0x1b   :  { %425 = vmatprep.subr.bf16.mxu1 %v513_v6  ;;  %p496_p3 = por %p495_p2, %p494_p1 }
  0x1c   :  { %412 = vmatpush3.bf16.msra.mxu0 %v479_v16 }
  0x1d   :  { %413 = vmatprep.subr.bf16.mxu0 %v513_v6  ;;  %p497_p4 = pnand %p496_p3, %p490_p0 }
  0x1e   :  { %426 = vmatpush3.bf16.msra.mxu1 %v484_v20 }
  0x1f   :  { %427 = vmatprep.subr.bf16.mxu1 %v513_v6 }
  0x20   :  { %414 = vmatpush3.bf16.msra.mxu0 %v480_v18 }
  0x22   :  { %428 = vmatpush3.bf16.msra.mxu1 %v485_v21 }
  0x23   :  { %429 = vmatprep.subr.bf16.mxu1 %v513_v6 }
  0x26   :  { %430 = vmatpush3.bf16.msra.mxu1 %v486_v2 }
  0x27   :  { %431 = vmatprep.subr.bf16.mxu1 %v513_v6 }
  0x2a   :  { %432 = vmatpush3.bf16.msra.mxu1 %v487_v3 }
  0x2b   :  { %433 = vmatprep.subr.bf16.mxu1 %v513_v6  ;;  %v368_v6 = vld [vmem:[%s650_s6] ss:$0 sm:$0xff] }
  0x2e   :  { %434 = vmatpush3.bf16.msra.mxu1 %v488_v4 }
  0x81   :  { %v451_v27 = vpop.permute.xlu0 %450  ;;  %v463_v28 = vpop.permute.xlu1 %462 }
  0x82   :  { %v453_v33 = vunpack.i.h.bf16 %v451_v27  ;;  %v452_v34 = vunpack.i.l.bf16 %v451_v27  ;;  %v465_v37 = vunpack.i.h.bf16 %v463_v28  ;;  %v464_v38 = vunpack.i.l.bf16 %v463_v28 }
  0x84   :  { %v49_v46 = vmul.f32 %v453_v33, %v47_v32  ;;  %v48_v47 = vmul.f32 %v452_v34, %v47_v32  ;;  %v81_v50 = vmul.f32 %v465_v37, %v79_v36  ;;  %v80_v51 = vmul.f32 %v464_v38, %v79_v36 }
  0x86   :  { %v457_v39 = vpop.permute.xlu0 %456  ;;  %v469_v41 = vpop.permute.xlu1 %468 }
  0x87   :  { %v459_v42 = vunpack.i.h.bf16 %v457_v39  ;;  %v458_v43 = vunpack.i.l.bf16 %v457_v39  ;;  %v471_v44 = vunpack.i.h.bf16 %v469_v41  ;;  %v470_v45 = vunpack.i.l.bf16 %v469_v41 }
  0x89   :  { %v65_v48 = vmul.f32 %v459_v42, %v63_v35  ;;  %v64_v49 = vmul.f32 %v458_v43, %v63_v35  ;;  %v97_v54 = vmul.f32 %v471_v44, %v95_v40  ;;  %v96_v55 = vmul.f32 %v470_v45, %v95_v40 }
  0x8b   :  { %v66_v52 = vadd.f32 %v64_v49, %v48_v47  ;;  %v67_v53 = vadd.f32 %v65_v48, %v49_v46 }
  0x8d   :  { %v82_v56 = vadd.f32 %v80_v51, %v66_v52  ;;  %v83_v57 = vadd.f32 %v81_v50, %v67_v53 }
  0x8f   :  { %v98_v59 = vadd.f32 %v96_v55, %v82_v56  ;;  %v99_v60 = vadd.f32 %v97_v54, %v83_v57 }
  0x91   :  { %v107_v61 = vadd.f32 %v358_v58, %v98_v59  ;;  %v108_v62 = vadd.f32 %v358_v58, %v99_v60 }
  0x93   :  { %v109_v63 = vmax.f32 %v107_v61, 0.0  ;;  %v110_v0 = vmax.f32 %v108_v62, 0.0 }
  0x95   :  { %v111_v1 = vpack.c.bf16 %v110_v0, %v109_v63 }
  0x97   :  { %416 = vmatmul.mubr.bf16.vlgmr.msra.gmra.mxu0 %v111_v1 }
 0x157   :  { %v217_v7 = vpop.f32.mrf.mxu0 }
 0x158   :  { %v218_v9 = vadd.f32 %v359_v5, %v217_v7 }
 0x159   :  { %v417_v8 = vpop.f32.mrf.mxu0 }
 0x15a   :  { %v224_v13 = vmax.f32 %v218_v9, 0.0 }
 0x15b   :  { %v220_v10 = vpop.f32.mrf.mxu0 }
 0x15c   :  { %v221_v11 = vadd.f32 %v359_v5, %v220_v10 }
 0x15d   :  { %v418_v12 = vpop.f32.mrf.mxu0 }
 0x15e   :  { %v225_v14 = vmax.f32 %v221_v11, 0.0 }
 0x160   :  { %v226_v15 = vpack.c.bf16 %v225_v14, %v224_v13 }
 0x162   :  { %436 = vmatmul.mubr.bf16.vlgmr.msra.gmra.mxu1 %v226_v15 }
 0x222   :  { %v332_v16 = vpop.f32.mrf.mxu1 }
 0x223   :  { %v333_v17 = vadd.f32 %v368_v6, %v332_v16 }
 0x224   :  { %v437_v18 = vpop.f32.mrf.mxu1 }
 0x225   :  { %340 = vst.msk [vmem:[#allocation2] sm:$0xff] %vm339_vm1, %v333_v17 }
 0x226   :  { %v335_v19 = vpop.f32.mrf.mxu1 }
 0x227   :  { %v336_v20 = vadd.f32 %v368_v6, %v335_v19 }
 0x228   :  { %v438_v21 = vpop.f32.mrf.mxu1 }
 0x229   :  { %341 = vst.msk [vmem:[#allocation2 + $0x8] sm:$0xff] %vm339_vm1, %v336_v20 }
 0x22a   :  { %500 = shalt.err (!%p497_p4)
}
 0x22b   :  { %s518_s6 = smov 128   ;;  %s519_s16 = smov 8  }
 0x22c   :  { %353 = dma.vmem_to_hbm [thread:$0]  %s348_s15, 256, %s651_s7, [#allocation3], %s518_s6, %s518_s6, %s519_s16  }
 0x22d   :  { %509 = dma.done.wait [#allocation3], 256  }
 0x22e   :  { %510 = vsyncadd [#allocation3], 4294967040 }
 0x22f   :  { %357 = vsyncpa [#allocation3], 1 }

// kernel: tpu_custom_call.1
= control target key start
LH: loop header
LB: loop body
LE: loop exit
PB: predicated region body
PF: predicated region fallthrough
CT: control target
= control target key end

     0   :  { %v511_v2 = vmov 0   ;;  %v512_v5 = vmov 2   ;;  %v513_v6 = vmov 0.0   ;;  %v514_v10 = vmov 1   ;;  %s644_s0 = inlined_call_operand.vmem [shape: bf16[16,4], index: 0, kind: input, shape index: {}]   ;;  %s645_s1 = inlined_call_operand.vmem [shape: bf16[4,128], index: 1, kind: input, shape index: {}]   ;;  %s646_s2 = inlined_call_operand.vmem [shape: f32[1,128], index: 2, kind: input, shape index: {}]   ;;  %s647_s3 = inlined_call_operand.vmem [shape: bf16[128,128], index: 3, kind: input, shape index: {}]   ;;  %s648_s4 = inlined_call_operand.vmem [shape: f32[1,128], index: 4, kind: input, shape index: {}]   ;;  %s649_s5 = inlined_call_operand.vmem [shape: bf16[128,32], index: 5, kind: input, shape index: {}]   ;;  %s650_s6 = inlined_call_operand.vmem [shape: f32[1,32], index: 6, kind: input, shape index: {}]   ;;  %s651_s7 = inlined_call_operand.hbm [shape: f32[16,32], index: 7, kind: output, shape index: {}]  }
   0x1   :  { %v378_v0 = vld [vmem:[%s644_s0] sm:$0xff]   ;;  %v473_v1 = vld [vmem:[%s647_s3 + $0x38] sm:$0xff]   ;;  %448 = vset.pattern.permute.xlu0 %v511_v2  ;;  %460 = vset.pattern.permute.xlu1 %v512_v5  ;;  %v474_v8 = vld [vmem:[%s647_s3 + $0x30] sm:$0xff]   ;;  %v515_v11 = vmov 3   ;;  %vm516_vm0 = vmmov 0  }
   0x2   :  { %v379_v3 = vunpack.c.l.bf16 %v378_v0  ;;  %v380_v4 = vunpack.c.h.bf16 %v378_v0  ;;  %399 = vmatprep.subr.bf16.mxu0 %v513_v6  ;;  %419 = vmatprep.subr.bf16.mxu1 %v513_v6  ;;  %v475_v9 = vld [vmem:[%s647_s3 + $0x28] sm:$0xff]   ;;  %v476_v12 = vld [vmem:[%s647_s3 + $0x20] sm:$0xff]   ;;  %v477_v13 = vld [vmem:[%s647_s3 + $0x18] sm:$0xff]  }
   0x3   :  { %400 = vmatpush3.bf16.msra.mxu0 %v473_v1  ;;  %415 = vmatprep.mubr.msk.bf16.mxu0 %vm516_vm0, %v513_v6 }
   0x4   :  { %v449_v7 = vpack.i.bf16 %v380_v4, %v379_v3  ;;  %401 = vmatprep.subr.bf16.mxu0 %v513_v6 }
   0x6   :  { %450 = vperm.xlu0 %448, %v449_v7   ;;  %462 = vperm.xlu1 %460, %v449_v7  }
   0x7   :  { %402 = vmatpush3.bf16.msra.mxu0 %v474_v8 }
   0x8   :  { %403 = vmatprep.subr.bf16.mxu0 %v513_v6 }
   0xa   :  { %454 = vset.pattern.permute.xlu0 %v514_v10  ;;  %466 = vset.pattern.permute.xlu1 %v515_v11 }
   0xb   :  { %456 = vperm.xlu0 %454, %v449_v7   ;;  %468 = vperm.xlu1 %466, %v449_v7  }
   0xc   :  { %404 = vmatpush3.bf16.msra.mxu0 %v475_v9 }
   0xd   :  { %405 = vmatprep.subr.bf16.mxu0 %v513_v6 }
   0xf   :  { %472 = vset.pattern.permute.xlu0 %v515_v11 }
  0x10   :  { %406 = vmatpush3.bf16.msra.mxu0 %v476_v12 }
  0x11   :  { %12 = vsyncpa [#allocation3], 0  ;;  %407 = vmatprep.subr.bf16.mxu0 %v513_v6  ;;  %435 = vmatprep.mubr.msk.bf16.mxu1 %vm516_vm0, %v513_v6  ;;  %v478_v14 = vld [vmem:[%s647_s3 + $0x10] sm:$0xff]   ;;  %v481_v15 = vld [vmem:[%s649_s5 + $0x38] sm:$0xff]   ;;  %v44_v22 = vlaneseq  ;;  %vm339_vm1 = vcmask 261120  }
  0x12   :  { %v479_v16 = vld [vmem:[%s647_s3 + $0x8] sm:$0xff]   ;;  %420 = vmatpush3.bf16.msra.mxu1 %v481_v15  ;;  %v482_v17 = vld [vmem:[%s649_s5 + $0x30] sm:$0xff]   ;;  %v480_v18 = vld [vmem:[%s647_s3] sm:$0xff]  }
  0x13   :  { %421 = vmatprep.subr.bf16.mxu1 %v513_v6  ;;  %v483_v19 = vld [vmem:[%s649_s5 + $0x28] sm:$0xff]   ;;  %v484_v20 = vld [vmem:[%s649_s5 + $0x20] sm:$0xff]   ;;  %v485_v21 = vld [vmem:[%s649_s5 + $0x18] sm:$0xff]   ;;  %v45_v23 = vshrl.u32 %v44_v22, 7 }
  0x14   :  { %408 = vmatpush3.bf16.msra.mxu0 %v477_v13  ;;  %v32_v24 = vld [vmem:[%s645_s1] sm:$0x3]  ;;  %v486_v2 = vld [vmem:[%s649_s5 + $0x10] sm:$0xff]   ;;  %v487_v3 = vld [vmem:[%s649_s5 + $0x8] sm:$0xff]  }
  0x15   :  { %409 = vmatprep.subr.bf16.mxu0 %v513_v6  ;;  %v33_v25 = vunpack.c.l.bf16 %v32_v24  ;;  %v46_v26 = vsub.s32 0, %v45_v23  ;;  %v62_v29 = vsub.s32 1, %v45_v23  ;;  %v78_v30 = vsub.s32 2, %v45_v23  ;;  %v358_v58 = vld [vmem:[%s646_s2] ss:$0 sm:$0xff] }
  0x16   :  { %422 = vmatpush3.bf16.msra.mxu1 %v482_v17  ;;  %v94_v31 = vsub.s32 3, %v45_v23  ;;  %v488_v4 = vld [vmem:[%s649_s5] sm:$0xff]   ;;  %s517_s5 = smov [#allocation2]  }
  0x17   :  { %423 = vmatprep.subr.bf16.mxu1 %v513_v6  ;;  %v47_v32 = vrot.slane %v33_v25, %v46_v26  ;;  %v63_v35 = vrot.slane %v33_v25, %v62_v29  ;;  %v79_v36 = vrot.slane %v33_v25, %v78_v30  ;;  %v359_v5 = vld [vmem:[%s648_s4] ss:$0 sm:$0xff]  ;;  %s347_s15 = sshll.u32 %s517_s5, 4  ;;  %s348_s15 = int_to_ptr.vmem [resolvable:$true] %s347_s15 }
  0x18   :  { %410 = vmatpush3.bf16.msra.mxu0 %v478_v14  ;;  %v95_v40 = vrot.slane %v33_v25, %v94_v31  ;;  %s489_s4 = scalar_lea.vmem %s348_s15, 256  ;;  %p494_p1 = scmp.lt.s32.totalorder %s348_s15, %s348_s15 }
  0x19   :  { %411 = vmatprep.subr.bf16.mxu0 %v513_v6  ;;  %p490_p0 = scmp.ne.s32.totalorder %s348_s15, %s489_s4  ;;  %p495_p2 = scmp.lt.s32.totalorder %s489_s4, %s489_s4 }
  0x1a   :  { %424 = vmatpush3.bf16.msra.mxu1 %v483_v19 }
  0x1b   :  { %425 = vmatprep.subr.bf16.mxu1 %v513_v6  ;;  %p496_p3 = por %p495_p2, %p494_p1 }
  0x1c   :  { %412 = vmatpush3.bf16.msra.mxu0 %v479_v16 }
  0x1d   :  { %413 = vmatprep.subr.bf16.mxu0 %v513_v6  ;;  %p497_p4 = pnand %p496_p3, %p490_p0 }
  0x1e   :  { %426 = vmatpush3.bf16.msra.mxu1 %v484_v20 }
  0x1f   :  { %427 = vmatprep.subr.bf16.mxu1 %v513_v6 }
  0x20   :  { %414 = vmatpush3.bf16.msra.mxu0 %v480_v18 }
  0x22   :  { %428 = vmatpush3.bf16.msra.mxu1 %v485_v21 }
  0x23   :  { %429 = vmatprep.subr.bf16.mxu1 %v513_v6 }
  0x26   :  { %430 = vmatpush3.bf16.msra.mxu1 %v486_v2 }
  0x27   :  { %431 = vmatprep.subr.bf16.mxu1 %v513_v6 }
  0x2a   :  { %432 = vmatpush3.bf16.msra.mxu1 %v487_v3 }
  0x2b   :  { %433 = vmatprep.subr.bf16.mxu1 %v513_v6  ;;  %v368_v6 = vld [vmem:[%s650_s6] ss:$0 sm:$0xff] }
  0x2e   :  { %434 = vmatpush3.bf16.msra.mxu1 %v488_v4 }
  0x81   :  { %v451_v27 = vpop.permute.xlu0 %450  ;;  %v463_v28 = vpop.permute.xlu1 %462 }
  0x82   :  { %v453_v33 = vunpack.i.h.bf16 %v451_v27  ;;  %v452_v34 = vunpack.i.l.bf16 %v451_v27  ;;  %v465_v37 = vunpack.i.h.bf16 %v463_v28  ;;  %v464_v38 = vunpack.i.l.bf16 %v463_v28 }
  0x84   :  { %v49_v46 = vmul.f32 %v453_v33, %v47_v32  ;;  %v48_v47 = vmul.f32 %v452_v34, %v47_v32  ;;  %v81_v50 = vmul.f32 %v465_v37, %v79_v36  ;;  %v80_v51 = vmul.f32 %v464_v38, %v79_v36 }
  0x86   :  { %v457_v39 = vpop.permute.xlu0 %456  ;;  %v469_v41 = vpop.permute.xlu1 %468 }
  0x87   :  { %v459_v42 = vunpack.i.h.bf16 %v457_v39  ;;  %v458_v43 = vunpack.i.l.bf16 %v457_v39  ;;  %v471_v44 = vunpack.i.h.bf16 %v469_v41  ;;  %v470_v45 = vunpack.i.l.bf16 %v469_v41 }
  0x89   :  { %v65_v48 = vmul.f32 %v459_v42, %v63_v35  ;;  %v64_v49 = vmul.f32 %v458_v43, %v63_v35  ;;  %v97_v54 = vmul.f32 %v471_v44, %v95_v40  ;;  %v96_v55 = vmul.f32 %v470_v45, %v95_v40 }
  0x8b   :  { %v66_v52 = vadd.f32 %v64_v49, %v48_v47  ;;  %v67_v53 = vadd.f32 %v65_v48, %v49_v46 }
  0x8d   :  { %v82_v56 = vadd.f32 %v80_v51, %v66_v52  ;;  %v83_v57 = vadd.f32 %v81_v50, %v67_v53 }
  0x8f   :  { %v98_v59 = vadd.f32 %v96_v55, %v82_v56  ;;  %v99_v60 = vadd.f32 %v97_v54, %v83_v57 }
  0x91   :  { %v107_v61 = vadd.f32 %v358_v58, %v98_v59  ;;  %v108_v62 = vadd.f32 %v358_v58, %v99_v60 }
  0x93   :  { %v109_v63 = vmax.f32 %v107_v61, 0.0  ;;  %v110_v0 = vmax.f32 %v108_v62, 0.0 }
  0x95   :  { %v111_v1 = vpack.c.bf16 %v110_v0, %v109_v63 }
  0x97   :  { %416 = vmatmul.mubr.bf16.vlgmr.msra.gmra.mxu0 %v111_v1 }
 0x157   :  { %v217_v7 = vpop.f32.mrf.mxu0 }
 0x158   :  { %v218_v9 = vadd.f32 %v359_v5, %v217_v7 }
 0x159   :  { %v417_v8 = vpop.f32.mrf.mxu0 }
 0x15a   :  { %v224_v13 = vmax.f32 %v218_v9, 0.0 }
 0x15b   :  { %v220_v10 = vpop.f32.mrf.mxu0 }
 0x15c   :  { %v221_v11 = vadd.f32 %v359_v5, %v220_v10 }
 0x15d   :  { %v418_v12 = vpop.f32.mrf.mxu0 }
 0x15e   :  { %v225_v14 = vmax.f32 %v221_v11, 0.0 }
 0x160   :  { %v226_v15 = vpack.c.bf16 %v225_v14, %v224_v13 }
 0x162   :  { %436 = vmatmul.mubr.bf16.vlgmr.msra.gmra.mxu1 %v226_v15 }
 0x222   :  { %v332_v16 = vpop.f32.mrf.mxu1 }
 0x223   :  { %v333_v17 = vadd.f32 %v368_v6, %v332_v16 }
 0x224   :  { %v437_v18 = vpop.f32.mrf.mxu1 }
 0x225   :  { %340 = vst.msk [vmem:[#allocation2] sm:$0xff] %vm339_vm1, %v333_v17 }
 0x226   :  { %v335_v19 = vpop.f32.mrf.mxu1 }
 0x227   :  { %v336_v20 = vadd.f32 %v368_v6, %v335_v19 }
 0x228   :  { %v438_v21 = vpop.f32.mrf.mxu1 }
 0x229   :  { %341 = vst.msk [vmem:[#allocation2 + $0x8] sm:$0xff] %vm339_vm1, %v336_v20 }
 0x22a   :  { %500 = shalt.err (!%p497_p4)
}
 0x22b   :  { %s518_s6 = smov 128   ;;  %s519_s16 = smov 8  }
 0x22c   :  { %353 = dma.vmem_to_hbm [thread:$0]  %s348_s15, 256, %s651_s7, [#allocation3], %s518_s6, %s518_s6, %s519_s16  }
 0x22d   :  { %509 = dma.done.wait [#allocation3], 256  }
 0x22e   :  { %510 = vsyncadd [#allocation3], 4294967040 }
 0x22f   :  { %357 = vsyncpa [#allocation3], 1 }

</bundles_post_ra>
